<compile_context>
chip_gen: v7x
topology: tpu7x:2x2x1
jax: 0.10.0
libtpu: 0.0.40
codegen_flags: <defaults>
</compile_context>

<pallas_src>
import math
import functools

import jax
import jax.numpy as jnp
from jax.experimental import pallas as pl
from jax.experimental.pallas import tpu as pltpu

NUM_HEAD = 2


def mhsa_kernel(x_ref, wqkv_ref, bqkv_ref, wo_ref, bo_ref,
                attn_ref, out_ref, *, num_head, head_dim):
    # x_ref:    (B_TILE, S, D)     input batch tile
    # wqkv_ref: (D, 3*D)           fused QKV weight (score scale folded into Q cols)
    # bqkv_ref: (1, 3*D)           fused QKV bias   (score scale folded into Q part)
    # wo_ref:   (D, D)             output projection weight
    # bo_ref:   (1, D)             output projection bias
    # attn_ref: (B_TILE, H, S*S)   attention probabilities, (sq, sk) flattened into lanes
    # out_ref:  (B_TILE, S, D)     final output
    B, S, D = x_ref.shape
    H, hd = num_head, head_dim
    dtype = x_ref.dtype                       # matmul operands stay in input dtype

    x2d = x_ref[...].reshape(B * S, D)        # one big M for the MXU

    # --- One fused QKV projection matmul: (B*S, D) @ (D, 3D) ----------------
    proj = jnp.dot(x2d, wqkv_ref[...], preferred_element_type=jnp.float32)
    proj = (proj + bqkv_ref[...].astype(jnp.float32)).astype(dtype)   # (B*S, 3D)

    attn_parts = []
    o_parts = []
    # Static loop over heads: H is tiny (2) and the per-head working set is a
    # few (S, hd)/(S, S) tiles, so vreg pressure is negligible.  For large H/S
    # this would become a head grid axis (which would also mean un-fusing the
    # QKV / output-projection matmuls), so the fused form is kept here.
    for h in range(H):
        q = proj[:, h * hd:(h + 1) * hd].reshape(B, S, hd)
        k = proj[:, D + h * hd:D + (h + 1) * hd].reshape(B, S, hd)
        v = proj[:, 2 * D + h * hd:2 * D + (h + 1) * hd].reshape(B, S, hd)

        # Scores (scale already folded into Wq/bq); contracting on the last
        # axis avoids materializing a transposed copy of K.
        s = jnp.einsum('bqd,bkd->bqk', q, k,
                       preferred_element_type=jnp.float32)        # (B, S, S)

        # Exact, max-stabilized softmax (no approximate reciprocal, so rows
        # sum to 1 like torch.softmax).
        m = jnp.max(s, axis=-1, keepdims=True)
        e = jnp.exp(s - m)
        p = (e / jnp.sum(e, axis=-1, keepdims=True)).astype(attn_ref.dtype)

        # Lane-dense staging: flatten the (sq, sk) square into the lane axis
        # via static row slices + lane concat (no tiled-dim reshape needed).
        p_flat = jnp.concatenate([p[:, sq:sq + 1, :] for sq in range(S)],
                                 axis=-1)                         # (B, 1, S*S)
        attn_parts.append(p_flat)

        o = jnp.einsum('bqk,bkd->bqd', p.astype(dtype), v,
                       preferred_element_type=jnp.float32)        # (B, S, hd)
        o_parts.append(o.astype(dtype).reshape(B * S, hd))

    # Single contiguous, lane-dense store of all heads' probabilities.
    attn_ref[...] = jnp.concatenate(attn_parts, axis=1)           # (B, H, S*S)

    # "Concat heads + final linear" as ONE matmul: lane-concat of head outputs
    # reproduces torch's head-major concat layout, then (B*S, D) @ (D, D).
    o_cat = jnp.concatenate(o_parts, axis=-1)                     # (B*S, D)
    out = jnp.dot(o_cat, wo_ref[...], preferred_element_type=jnp.float32)
    out = out + bo_ref[...].astype(jnp.float32)
    out_ref[...] = out.reshape(B, S, D).astype(out_ref.dtype)


def _pick_batch_tile(bs, S, D, H, itemsize, weight_bytes,
                     vmem_budget_bytes=24 * 1024 * 1024):
    """Largest divisor of bs such that (a) the grid keeps >= 2 steps when
    bs > 1, so a v7x megacore can shard the 'parallel' axis over both
    TensorCores, and (b) the double-buffered activation blocks plus the
    single-buffered weights fit a conservative VMEM byte budget (v7x is the
    tight case: 64 MiB physical / 32 MiB default scoped)."""
    cap = bs if bs == 1 else bs // 2
    best = 1
    for d in range(1, max(cap, 1) + 1):
        if bs % d:
            continue
        act_bytes = d * (S * D + H * S * S + S * D) * itemsize  # x + attn + out blocks
        if 2 * act_bytes + weight_bytes <= vmem_budget_bytes:   # 2x: double-buffered
            best = d
    return best


def multi_head_self_attention(x, w_proj, b_proj, w_out, b_out, *, num_head):
    bs, seqlen, model_dim = x.shape
    D, H, S = model_dim, num_head, seqlen
    hd = D // H
    scale = 1.0 / math.sqrt(hd)

    # --- Host-side weight prep (done once) ----------------------------------
    # Fold the 1/sqrt(head_dim) score scale into the Q columns of the fused
    # QKV projection so the kernel never scales the scores.
    col_scale = jnp.concatenate(
        [jnp.full((D,), scale, w_proj.dtype), jnp.ones((2 * D,), w_proj.dtype)])
    w_qkv = w_proj * col_scale[None, :]           # (D, 3D)
    b_qkv = (b_proj * col_scale).reshape(1, 3 * D)
    bo2 = b_out.reshape(1, D)
    # (Pass bf16 x / weights to run the MXU in bf16 with f32 accumulation; the
    #  default f32 path keeps parity with the PyTorch module.)

    itemsize = jnp.dtype(x.dtype).itemsize
    weight_bytes = (w_qkv.size + b_qkv.size + w_out.size + bo2.size) * itemsize
    b_tile = _pick_batch_tile(bs, S, D, H, itemsize, weight_bytes)
    grid = (bs // b_tile,)

    kernel = functools.partial(mhsa_kernel, num_head=H, head_dim=hd)

    # Weights/biases have a constant index_map -> single-buffer them so the
    # pipeline does not hold a redundant second copy in VMEM.
    def wspec(shape):
        return pl.BlockSpec(shape, lambda i, _s=len(shape): (0,) * _s,
                            pipeline_mode=pl.Buffered(1))

    attn_flat, out = pl.pallas_call(
        kernel,
        out_shape=(
            jax.ShapeDtypeStruct((bs, H, S * S), x.dtype),
            jax.ShapeDtypeStruct((bs, S, D), x.dtype),
        ),
        grid_spec=pltpu.PrefetchScalarGridSpec(
            num_scalar_prefetch=0,
            grid=grid,
            in_specs=[
                pl.BlockSpec((b_tile, S, D), lambda i: (i, 0, 0)),
                wspec((D, 3 * D)),
                wspec((1, 3 * D)),
                wspec((D, D)),
                wspec((1, D)),
            ],
            out_specs=[
                pl.BlockSpec((b_tile, H, S * S), lambda i: (i, 0, 0)),
                pl.BlockSpec((b_tile, S, D), lambda i: (i, 0, 0)),
            ],
        ),
        compiler_params=pltpu.CompilerParams(
            dimension_semantics=("parallel",),
            vmem_limit_bytes=32 * 1024 * 1024),
    )(x, w_qkv, b_qkv, w_out, bo2)

    # Match PyTorch: attn_prob is (bs * num_head, seqlen, seqlen).
    attn = attn_flat.reshape(bs * H, S, S)
    return attn, out


def _reference(x, w_proj, b_proj, w_out, b_out, num_head):
    bs, S, D = x.shape
    hd = D // num_head
    proj = x @ w_proj + b_proj
    q, k, v = jnp.split(proj, 3, axis=-1)

    def heads(t):
        return t.reshape(bs, S, num_head, hd).transpose(0, 2, 1, 3).reshape(bs * num_head, S, hd)

    q, k, v = heads(q), heads(k), heads(v)
    scores = jnp.einsum("bqd,bkd->bqk", q, k) / math.sqrt(hd)
    p = jax.nn.softmax(scores, axis=-1)
    o = jnp.einsum("bqk,bkd->bqd", p, v)
    o = o.reshape(bs, num_head, S, hd).transpose(0, 2, 1, 3).reshape(bs, S, D)
    return p, o @ w_out + b_out


if __name__ == "__main__":
    bs, seqlen, model_dim = 2, 8, 32
    num_head = NUM_HEAD
    key = jax.random.PRNGKey(0)
    k1, k2, k3, k4, k5 = jax.random.split(key, 5)

    # Deterministic parameter init (nn.Linear-style uniform bounds).
    bound_p = 1.0 / math.sqrt(model_dim)
    x = jax.random.normal(k1, (bs, seqlen, model_dim), dtype=jnp.float32)
    w_proj = jax.random.uniform(k2, (model_dim, 3 * model_dim), jnp.float32, -bound_p, bound_p)
    b_proj = jax.random.uniform(k3, (3 * model_dim,), jnp.float32, -bound_p, bound_p)
    w_out = jax.random.uniform(k4, (model_dim, model_dim), jnp.float32, -bound_p, bound_p)
    b_out = jax.random.uniform(k5, (model_dim,), jnp.float32, -bound_p, bound_p)

    attn, out = multi_head_self_attention(x, w_proj, b_proj, w_out, b_out, num_head=num_head)
    jax.block_until_ready((attn, out))

    attn_ref, out_ref = _reference(x, w_proj, b_proj, w_out, b_out, num_head)
    assert attn.shape == (bs * num_head, seqlen, seqlen)
    assert out.shape == (bs, seqlen, model_dim)
    # Softmax is exact now; the remaining tolerance only covers TPU matmul
    # precision differences between the kernel (f32 accumulation on the MXU)
    # and the default-precision XLA reference einsums.
    assert jnp.allclose(attn, attn_ref, atol=1e-2, rtol=1e-2)
    assert jnp.allclose(out, out_ref, atol=1e-2, rtol=1e-2)

    print("KERNEL_OK")
</pallas_src>

<mosaic_0001>
module attributes {stable_mosaic.version = 11 : i64} {
  func.func @mhsa_kernel(%arg0: i32, %arg1: memref<1x8x32xf32, #tpu.memory_space<vmem>>, %arg2: memref<32x96xf32, #tpu.memory_space<vmem>>, %arg3: memref<1x96xf32, #tpu.memory_space<vmem>>, %arg4: memref<32x32xf32, #tpu.memory_space<vmem>>, %arg5: memref<1x32xf32, #tpu.memory_space<vmem>>, %arg6: memref<1x2x64xf32, #tpu.memory_space<vmem>>, %arg7: memref<1x8x32xf32, #tpu.memory_space<vmem>>) attributes {dimension_semantics = [#tpu.dimension_semantics<parallel>], iteration_bounds = array<i64: 2>, scalar_prefetch = 0 : i64, scratch_operands = 0 : i64, tpu.core_type = #tpu.core_type<tc>, window_params = [{transform_indices = @transform_0, window_bounds = array<i64: 1, 8, 32>}, {pipeline_mode = #tpu.pipeline_mode<synchronous>, transform_indices = @transform_1, window_bounds = array<i64: 32, 96>}, {pipeline_mode = #tpu.pipeline_mode<synchronous>, transform_indices = @transform_2, window_bounds = array<i64: 1, 96>}, {pipeline_mode = #tpu.pipeline_mode<synchronous>, transform_indices = @transform_3, window_bounds = array<i64: 32, 32>}, {pipeline_mode = #tpu.pipeline_mode<synchronous>, transform_indices = @transform_4, window_bounds = array<i64: 1, 32>}, {transform_indices = @transform_5, window_bounds = array<i64: 1, 2, 64>}, {transform_indices = @transform_6, window_bounds = array<i64: 1, 8, 32>}]} {
    %c0 = arith.constant 0 : index
    %c0_0 = arith.constant 0 : index
    %c0_1 = arith.constant 0 : index
    %0 = vector.load %arg1[%c0, %c0_0, %c0_1] : memref<1x8x32xf32, #tpu.memory_space<vmem>>, vector<1x8x32xf32>
    %1 = vector.shape_cast %0 : vector<1x8x32xf32> to vector<8x32xf32>
    %c0_2 = arith.constant 0 : index
    %c0_3 = arith.constant 0 : index
    %2 = vector.load %arg2[%c0_2, %c0_3] : memref<32x96xf32, #tpu.memory_space<vmem>>, vector<32x96xf32>
    %cst = arith.constant dense<0.000000e+00> : vector<8x96xf32>
    %3 = tpu.matmul %1, %2, %cst {dimension_numbers = #tpu.dot_dimension_numbers<[1], [0], [0], [1], [0, 0, 1, 1], [], []>} : vector<8x32xf32>, vector<32x96xf32>, vector<8x96xf32> -> vector<8x96xf32>
    %c0_4 = arith.constant 0 : index
    %c0_5 = arith.constant 0 : index
    %4 = vector.load %arg3[%c0_4, %c0_5] : memref<1x96xf32, #tpu.memory_space<vmem>>, vector<1x96xf32>
    %5 = vector.broadcast %4 : vector<1x96xf32> to vector<8x96xf32>
    %6 = arith.addf %3, %5 : vector<8x96xf32>
    %7 = vector.extract_strided_slice %6 {offsets = [0, 0], sizes = [8, 16], strides = [1, 1]} : vector<8x96xf32> to vector<8x16xf32>
    %8 = vector.shape_cast %7 : vector<8x16xf32> to vector<1x8x16xf32>
    %9 = vector.extract_strided_slice %6 {offsets = [0, 32], sizes = [8, 16], strides = [1, 1]} : vector<8x96xf32> to vector<8x16xf32>
    %10 = vector.shape_cast %9 : vector<8x16xf32> to vector<1x8x16xf32>
    %11 = vector.extract_strided_slice %6 {offsets = [0, 64], sizes = [8, 16], strides = [1, 1]} : vector<8x96xf32> to vector<8x16xf32>
    %12 = vector.shape_cast %11 : vector<8x16xf32> to vector<1x8x16xf32>
    "tpu.trace_start"() <{level = 10 : i32, message = "bqd,bkd->bqk"}> : () -> ()
    %cst_6 = arith.constant dense<0.000000e+00> : vector<1x8x8xf32>
    %13 = tpu.matmul %8, %10, %cst_6 {dimension_numbers = #tpu.dot_dimension_numbers<[2], [2], [1], [1], [0, 0, 0, 1, 1, 1], [0], [0]>} : vector<1x8x16xf32>, vector<1x8x16xf32>, vector<1x8x8xf32> -> vector<1x8x8xf32>
    "tpu.trace_stop"() : () -> ()
    %cst_7 = arith.constant dense<0xFF800000> : vector<1x8xf32>
    %14 = vector.multi_reduction <maximumf>, %13, %cst_7 [2] : vector<1x8x8xf32> to vector<1x8xf32>
    %15 = vector.shape_cast %14 : vector<1x8xf32> to vector<1x8x1xf32>
    %16 = vector.broadcast %15 : vector<1x8x1xf32> to vector<1x8x8xf32>
    %17 = arith.subf %13, %16 : vector<1x8x8xf32>
    %18 = math.exp %17 : vector<1x8x8xf32>
    %cst_8 = arith.constant dense<0.000000e+00> : vector<1x8xf32>
    %19 = vector.multi_reduction <add>, %18, %cst_8 [2] : vector<1x8x8xf32> to vector<1x8xf32>
    %20 = vector.shape_cast %19 : vector<1x8xf32> to vector<1x8x1xf32>
    %21 = vector.broadcast %20 : vector<1x8x1xf32> to vector<1x8x8xf32>
    %22 = arith.divf %18, %21 : vector<1x8x8xf32>
    %23 = vector.extract_strided_slice %22 {offsets = [0, 0, 0], sizes = [1, 1, 8], strides = [1, 1, 1]} : vector<1x8x8xf32> to vector<1x1x8xf32>
    %24 = vector.extract_strided_slice %22 {offsets = [0, 1, 0], sizes = [1, 1, 8], strides = [1, 1, 1]} : vector<1x8x8xf32> to vector<1x1x8xf32>
    %25 = vector.extract_strided_slice %22 {offsets = [0, 2, 0], sizes = [1, 1, 8], strides = [1, 1, 1]} : vector<1x8x8xf32> to vector<1x1x8xf32>
    %26 = vector.extract_strided_slice %22 {offsets = [0, 3, 0], sizes = [1, 1, 8], strides = [1, 1, 1]} : vector<1x8x8xf32> to vector<1x1x8xf32>
    %27 = vector.extract_strided_slice %22 {offsets = [0, 4, 0], sizes = [1, 1, 8], strides = [1, 1, 1]} : vector<1x8x8xf32> to vector<1x1x8xf32>
    %28 = vector.extract_strided_slice %22 {offsets = [0, 5, 0], sizes = [1, 1, 8], strides = [1, 1, 1]} : vector<1x8x8xf32> to vector<1x1x8xf32>
    %29 = vector.extract_strided_slice %22 {offsets = [0, 6, 0], sizes = [1, 1, 8], strides = [1, 1, 1]} : vector<1x8x8xf32> to vector<1x1x8xf32>
    %30 = vector.extract_strided_slice %22 {offsets = [0, 7, 0], sizes = [1, 1, 8], strides = [1, 1, 1]} : vector<1x8x8xf32> to vector<1x1x8xf32>
    %31 = tpu.concatenate %23, %24, %25, %26, %27, %28, %29, %30 in 2 : vector<1x1x8xf32>, vector<1x1x8xf32>, vector<1x1x8xf32>, vector<1x1x8xf32>, vector<1x1x8xf32>, vector<1x1x8xf32>, vector<1x1x8xf32>, vector<1x1x8xf32> -> vector<1x1x64xf32>
    "tpu.trace_start"() <{level = 10 : i32, message = "bqk,bkd->bqd"}> : () -> ()
    %cst_9 = arith.constant dense<0.000000e+00> : vector<1x8x16xf32>
    %32 = tpu.matmul %22, %12, %cst_9 {dimension_numbers = #tpu.dot_dimension_numbers<[2], [1], [1], [2], [0, 0, 0, 1, 1, 2], [0], [0]>} : vector<1x8x8xf32>, vector<1x8x16xf32>, vector<1x8x16xf32> -> vector<1x8x16xf32>
    "tpu.trace_stop"() : () -> ()
    %33 = vector.shape_cast %32 : vector<1x8x16xf32> to vector<8x16xf32>
    %34 = vector.extract_strided_slice %6 {offsets = [0, 16], sizes = [8, 16], strides = [1, 1]} : vector<8x96xf32> to vector<8x16xf32>
    %35 = vector.shape_cast %34 : vector<8x16xf32> to vector<1x8x16xf32>
    %36 = vector.extract_strided_slice %6 {offsets = [0, 48], sizes = [8, 16], strides = [1, 1]} : vector<8x96xf32> to vector<8x16xf32>
    %37 = vector.shape_cast %36 : vector<8x16xf32> to vector<1x8x16xf32>
    %38 = vector.extract_strided_slice %6 {offsets = [0, 80], sizes = [8, 16], strides = [1, 1]} : vector<8x96xf32> to vector<8x16xf32>
    %39 = vector.shape_cast %38 : vector<8x16xf32> to vector<1x8x16xf32>
    "tpu.trace_start"() <{level = 10 : i32, message = "bqd,bkd->bqk"}> : () -> ()
    %cst_10 = arith.constant dense<0.000000e+00> : vector<1x8x8xf32>
    %40 = tpu.matmul %35, %37, %cst_10 {dimension_numbers = #tpu.dot_dimension_numbers<[2], [2], [1], [1], [0, 0, 0, 1, 1, 1], [0], [0]>} : vector<1x8x16xf32>, vector<1x8x16xf32>, vector<1x8x8xf32> -> vector<1x8x8xf32>
    "tpu.trace_stop"() : () -> ()
    %cst_11 = arith.constant dense<0xFF800000> : vector<1x8xf32>
    %41 = vector.multi_reduction <maximumf>, %40, %cst_11 [2] : vector<1x8x8xf32> to vector<1x8xf32>
    %42 = vector.shape_cast %41 : vector<1x8xf32> to vector<1x8x1xf32>
    %43 = vector.broadcast %42 : vector<1x8x1xf32> to vector<1x8x8xf32>
    %44 = arith.subf %40, %43 : vector<1x8x8xf32>
    %45 = math.exp %44 : vector<1x8x8xf32>
    %cst_12 = arith.constant dense<0.000000e+00> : vector<1x8xf32>
    %46 = vector.multi_reduction <add>, %45, %cst_12 [2] : vector<1x8x8xf32> to vector<1x8xf32>
    %47 = vector.shape_cast %46 : vector<1x8xf32> to vector<1x8x1xf32>
    %48 = vector.broadcast %47 : vector<1x8x1xf32> to vector<1x8x8xf32>
    %49 = arith.divf %45, %48 : vector<1x8x8xf32>
    %50 = vector.extract_strided_slice %49 {offsets = [0, 0, 0], sizes = [1, 1, 8], strides = [1, 1, 1]} : vector<1x8x8xf32> to vector<1x1x8xf32>
    %51 = vector.extract_strided_slice %49 {offsets = [0, 1, 0], sizes = [1, 1, 8], strides = [1, 1, 1]} : vector<1x8x8xf32> to vector<1x1x8xf32>
    %52 = vector.extract_strided_slice %49 {offsets = [0, 2, 0], sizes = [1, 1, 8], strides = [1, 1, 1]} : vector<1x8x8xf32> to vector<1x1x8xf32>
    %53 = vector.extract_strided_slice %49 {offsets = [0, 3, 0], sizes = [1, 1, 8], strides = [1, 1, 1]} : vector<1x8x8xf32> to vector<1x1x8xf32>
    %54 = vector.extract_strided_slice %49 {offsets = [0, 4, 0], sizes = [1, 1, 8], strides = [1, 1, 1]} : vector<1x8x8xf32> to vector<1x1x8xf32>
    %55 = vector.extract_strided_slice %49 {offsets = [0, 5, 0], sizes = [1, 1, 8], strides = [1, 1, 1]} : vector<1x8x8xf32> to vector<1x1x8xf32>
    %56 = vector.extract_strided_slice %49 {offsets = [0, 6, 0], sizes = [1, 1, 8], strides = [1, 1, 1]} : vector<1x8x8xf32> to vector<1x1x8xf32>
    %57 = vector.extract_strided_slice %49 {offsets = [0, 7, 0], sizes = [1, 1, 8], strides = [1, 1, 1]} : vector<1x8x8xf32> to vector<1x1x8xf32>
    %58 = tpu.concatenate %50, %51, %52, %53, %54, %55, %56, %57 in 2 : vector<1x1x8xf32>, vector<1x1x8xf32>, vector<1x1x8xf32>, vector<1x1x8xf32>, vector<1x1x8xf32>, vector<1x1x8xf32>, vector<1x1x8xf32>, vector<1x1x8xf32> -> vector<1x1x64xf32>
    "tpu.trace_start"() <{level = 10 : i32, message = "bqk,bkd->bqd"}> : () -> ()
    %cst_13 = arith.constant dense<0.000000e+00> : vector<1x8x16xf32>
    %59 = tpu.matmul %49, %39, %cst_13 {dimension_numbers = #tpu.dot_dimension_numbers<[2], [1], [1], [2], [0, 0, 0, 1, 1, 2], [0], [0]>} : vector<1x8x8xf32>, vector<1x8x16xf32>, vector<1x8x16xf32> -> vector<1x8x16xf32>
    "tpu.trace_stop"() : () -> ()
    %60 = vector.shape_cast %59 : vector<1x8x16xf32> to vector<8x16xf32>
    %61 = tpu.concatenate %31, %58 in 1 : vector<1x1x64xf32>, vector<1x1x64xf32> -> vector<1x2x64xf32>
    %c0_14 = arith.constant 0 : index
    %c0_15 = arith.constant 0 : index
    %c0_16 = arith.constant 0 : index
    %62 = vector.load %arg6[%c0_14, %c0_15, %c0_16] : memref<1x2x64xf32, #tpu.memory_space<vmem>>, vector<1x2x64xf32>
    tpu.vector_store %arg6[%c0_14, %c0_15, %c0_16], %61 {strides = array<i32>} : memref<1x2x64xf32, #tpu.memory_space<vmem>>, vector<1x2x64xf32>,
    %63 = tpu.concatenate %33, %60 in 1 : vector<8x16xf32>, vector<8x16xf32> -> vector<8x32xf32>
    %c0_17 = arith.constant 0 : index
    %c0_18 = arith.constant 0 : index
    %64 = vector.load %arg4[%c0_17, %c0_18] : memref<32x32xf32, #tpu.memory_space<vmem>>, vector<32x32xf32>
    %cst_19 = arith.constant dense<0.000000e+00> : vector<8x32xf32>
    %65 = tpu.matmul %63, %64, %cst_19 {dimension_numbers = #tpu.dot_dimension_numbers<[1], [0], [0], [1], [0, 0, 1, 1], [], []>} : vector<8x32xf32>, vector<32x32xf32>, vector<8x32xf32> -> vector<8x32xf32>
    %c0_20 = arith.constant 0 : index
    %c0_21 = arith.constant 0 : index
    %66 = vector.load %arg5[%c0_20, %c0_21] : memref<1x32xf32, #tpu.memory_space<vmem>>, vector<1x32xf32>
    %67 = vector.broadcast %66 : vector<1x32xf32> to vector<8x32xf32>
    %68 = arith.addf %65, %67 : vector<8x32xf32>
    %69 = vector.shape_cast %68 : vector<8x32xf32> to vector<1x8x32xf32>
    %c0_22 = arith.constant 0 : index
    %c0_23 = arith.constant 0 : index
    %c0_24 = arith.constant 0 : index
    %70 = vector.load %arg7[%c0_22, %c0_23, %c0_24] : memref<1x8x32xf32, #tpu.memory_space<vmem>>, vector<1x8x32xf32>
    tpu.vector_store %arg7[%c0_22, %c0_23, %c0_24], %69 {strides = array<i32>} : memref<1x8x32xf32, #tpu.memory_space<vmem>>, vector<1x8x32xf32>,
    return
  }
  func.func @transform_0(%arg0: i32) -> (i32, i32, i32) {
    %c0_i32 = arith.constant 0 : i32
    %c0_i32_0 = arith.constant 0 : i32
    %c0_i32_1 = arith.constant 0 : i32
    return %arg0, %c0_i32, %c0_i32_0 : i32, i32, i32
  }
  func.func @transform_1(%arg0: i32) -> (i32, i32) {
    %c0_i32 = arith.constant 0 : i32
    %c0_i32_0 = arith.constant 0 : i32
    %c0_i32_1 = arith.constant 0 : i32
    return %c0_i32, %c0_i32_0 : i32, i32
  }
  func.func @transform_2(%arg0: i32) -> (i32, i32) {
    %c0_i32 = arith.constant 0 : i32
    %c0_i32_0 = arith.constant 0 : i32
    %c0_i32_1 = arith.constant 0 : i32
    return %c0_i32, %c0_i32_0 : i32, i32
  }
  func.func @transform_3(%arg0: i32) -> (i32, i32) {
    %c0_i32 = arith.constant 0 : i32
    %c0_i32_0 = arith.constant 0 : i32
    %c0_i32_1 = arith.constant 0 : i32
    return %c0_i32, %c0_i32_0 : i32, i32
  }
  func.func @transform_4(%arg0: i32) -> (i32, i32) {
    %c0_i32 = arith.constant 0 : i32
    %c0_i32_0 = arith.constant 0 : i32
    %c0_i32_1 = arith.constant 0 : i32
    return %c0_i32, %c0_i32_0 : i32, i32
  }
  func.func @transform_5(%arg0: i32) -> (i32, i32, i32) {
    %c0_i32 = arith.constant 0 : i32
    %c0_i32_0 = arith.constant 0 : i32
    %c0_i32_1 = arith.constant 0 : i32
    return %arg0, %c0_i32, %c0_i32_0 : i32, i32, i32
  }
  func.func @transform_6(%arg0: i32) -> (i32, i32, i32) {
    %c0_i32 = arith.constant 0 : i32
    %c0_i32_0 = arith.constant 0 : i32
    %c0_i32_1 = arith.constant 0 : i32
    return %arg0, %c0_i32, %c0_i32_0 : i32, i32, i32
  }
}

</mosaic_0001>

<bundles_post_ra>
// kernel: tpu_custom_call.1
= control target key start
LH: loop header
LB: loop body
LE: loop exit
PB: predicated region body
PF: predicated region fallthrough
CT: control target
= control target key end

     0   :  { %12 = vsyncpa [#allocation3], 0  ;;  %s1816_s0 = inlined_call_operand.hbm [shape: f32[2,8,32], index: 0, kind: input, shape index: {}]   ;;  %s1817_s1 = inlined_call_operand.hbm [shape: f32[32,96], index: 1, kind: input, shape index: {}]   ;;  %s1818_s2 = inlined_call_operand.vmem [shape: f32[1,96], index: 2, kind: input, shape index: {}]   ;;  %s1819_s3 = inlined_call_operand.hbm [shape: f32[32,32], index: 3, kind: input, shape index: {}]   ;;  %s1820_s4 = inlined_call_operand.vmem [shape: f32[1,32], index: 4, kind: input, shape index: {}]   ;;  %s1821_s5 = inlined_call_operand.hbm [shape: f32[2,2,64], index: 5, kind: output, shape index: {0}]   ;;  %s1822_s6 = inlined_call_operand.hbm [shape: f32[2,8,32], index: 6, kind: output, shape index: {1}]  }
   0x1   :  { %14 = vsyncpa [#allocation3 + $0x1], 0 }
   0x2   :  { %15 = vsyncpa [#allocation6], 0 }
   0x3   :  { %16 = vsyncpa [#allocation4], 0 }
   0x4   :  { %18 = vsyncpa [#allocation4 + $0x1], 0 }
   0x5   :  { %19 = vsyncpa [#allocation10], 0 }
   0x6   :  { %21 = vsyncpa [#allocation10 + $0x1], 0  ;;  %s1491_s21 = smov 0   ;;  %s1493_s22 = smov 0  }
   0x7   :  { %s1495_s23 = smov 0   ;;  %s1497_s24 = smov 0  }
   0x8 LB: > { %s1512_s25 = sadd.s32 4294967295, %s1433_s24   ;;  %s1048_s26 = sadd.s32 4294967294, %s1433_s24   ;;  %s1433_s24 = sphi %s1497_s24, %s1842_s24   ;;  %s1429_s23 = sphi %s1495_s23, %s1841_s23   ;;  %s1425_s22 = sphi %s1493_s22, %s1840_s22   ;;  %s1421_s21 = sphi %s1491_s21, %s1839_s21  }
   0x9   : > { %p47_p0 = scmp.ne.s32.totalorder %s1425_s22, %s1421_s21  ;;  %p1823_p1 = scmp.eq.s32.totalorder %s1512_s25, 0 }
   0xa   : > { %p161_p3 = scmp.eq.s32.totalorder %s1048_s26, 1  ;;  %p1049_p5 = scmp.ge.s32.totalorder %s1433_s24, 1 }
   0xb   : > { %p1521_p4 = por %p1823_p1, %p47_p0  ;;  %p194_p7 = scmp.lt.s32.totalorder %s1433_s24, 3 }
   0xc   : > { %p1526_p6 = por %p161_p3, %p47_p0  ;;  %s1435_s30 = smov [#allocation5]  }
   0xd   : > { %s1826_s27 = scalar_select %p1521_p4, 1, 0 }
   0xe   : > { %s1827_s28 = scalar_select %p1526_p6, 1, 0 }
   0xf   : > { %p1531_p8 = pnand %p1049_p5, %p194_p7  ;;  %s206_s7 = sshll.u32 %s1435_s30, 4  ;;  %s1535_s7 = int_to_ptr.vmem [resolvable:$true] %s206_s7 }
  0x10   : > { %s1436_s9 = smov [#allocation7]   ;;  %s1245_s13 = scalar_lea.hbm %s1817_s1, 512 }
  0x11   : > { %p1163_p9 = pneg %p1531_p8  ;;  %s222_s10 = sshll.u32 %s1436_s9, 4  ;;  %s1546_s10 = int_to_ptr.vmem [resolvable:$true] %s222_s10 }
  0x12   : > { %p1246_p12 = scmp.ne.s32.totalorder %s1817_s1, %s1245_s13  ;;  %p1252_p5 = scmp.lt.u32.totalorder %s1245_s13, %s1817_s1 }
  0x13   : > { %p1542_p11 = pnand %p1163_p9, %p1823_p1 }
  0x15   : > { %p1247_p13 = pneg %p1542_p11 }
  0x17   : > { %p1248_p0 = pnand %p1247_p13, %p1246_p12 }
  0x19   : > { %p1249_p3 = pneg %p1248_p0 }
  0x1b   : > { %p1254_p7 = pnand %p1252_p5, %p1249_p3 }
  0x1d   : > { %1257 = shalt.err (!%p1254_p7)
}
  0x1e   : > { %s1258_s18 = scalar_lea.vmem %s1535_s7, 512  ;;  %p1266_p2 = scmp.lt.s32.totalorder %s1535_s7, %s1535_s7 }
  0x1f   : > { %p1259_p9 = scmp.ne.s32.totalorder %s1535_s7, %s1258_s18  ;;  %p1267_p12 = scmp.lt.s32.totalorder %s1258_s18, %s1258_s18 }
  0x21   : > { %p1261_p10 = pnand %p1259_p9, %p1247_p13  ;;  %p1268_p0 = por %p1267_p12, %p1266_p2 }
  0x23   : > { %p1262_p1 = pneg %p1261_p10 }
  0x25   : > { %p1269_p6 = pnand %p1268_p0, %p1262_p1 }
  0x27   : > { %1272 = shalt.err (!%p1269_p6)
}
  0x28   : > { %s1437_s19 = smov 128   ;;  %s1438_s20 = smov 8  }
  0x29   : > { %1166 = dma.hbm_to_vmem [thread:$0]  (!%p1542_p11), %s1817_s1, 512, %s1535_s7, [#allocation6], %s1437_s19, %s1437_s19, %s1438_s20  }
  0x2a   : > { %s1273_s12 = scalar_lea.hbm %s1819_s3, 512 }
  0x2b   : > { %p1274_p2 = scmp.ne.s32.totalorder %s1819_s3, %s1273_s12  ;;  %p1280_p10 = scmp.lt.u32.totalorder %s1273_s12, %s1819_s3 }
  0x2d   : > { %p1276_p1 = pnand %p1274_p2, %p1247_p13 }
  0x2f   : > { %p1277_p6 = pneg %p1276_p1 }
  0x31   : > { %p1282_p3 = pnand %p1280_p10, %p1277_p6 }
  0x33   : > { %1285 = shalt.err (!%p1282_p3)
}
  0x34   : > { %s1286_s7 = scalar_lea.vmem %s1546_s10, 512  ;;  %p1294_p12 = scmp.lt.s32.totalorder %s1546_s10, %s1546_s10 }
  0x35   : > { %p1287_p5 = scmp.ne.s32.totalorder %s1546_s10, %s1286_s7  ;;  %p1295_p0 = scmp.lt.s32.totalorder %s1286_s7, %s1286_s7 }
  0x37   : > { %p1289_p7 = pnand %p1287_p5, %p1247_p13  ;;  %p1296_p2 = por %p1295_p0, %p1294_p12 }
  0x39   : > { %p1290_p9 = pneg %p1289_p7 }
  0x3b   : > { %p1297_p1 = pnand %p1296_p2, %p1290_p9 }
  0x3d   : > { %1300 = shalt.err (!%p1297_p1)
}
  0x3e   : > { %1169 = dma.hbm_to_vmem [thread:$0]  (!%p1542_p11), %s1819_s3, 512, %s1546_s10, [#allocation6], %s1437_s19, %s1437_s19, %s1438_s20  }
  0x3f   : > { %s1601_s26 = sadd.s32 1, %s1433_s24   ;;  %s34_s8 = sadd.s32 1, %s1429_s23 }
  0x40   : > { %s31_s30 = ssub.s32 %s1433_s24, %s1601_s26  ;;  %p41_p13 = scmp.ne.s32.totalorder %s1429_s23, %s1425_s22 }
  0x41   : > { %p32_p6 = scmp.eq.s32.totalorder %s31_s30, 0  ;;  %p42_p10 = scmp.eq.s32.totalorder %s1433_s24, 0 }
  0x42   : > { %p1830_p3 = scmp.eq.s32.totalorder %s1512_s25, 1  ;;  %p1183_p7 = scmp.lt.s32.totalorder %s1433_s24, 2 }
  0x43   : > { %s1617_s11 = scalar_select %p32_p6, %s1429_s23, %s34_s8  }
  0x44   : > { %p1611_p5 = por %p1830_p3, %p41_p13  ;;  %p43_p9 = por %p42_p10, %p41_p13 }
  0x45   : > { %s239_s12 = sand.u32 1, %s1429_s23   ;;  %s1054_s10 = sshll.u32 %s1433_s24, 7 }
  0x46   : > { %s1831_s9 = scalar_select %p1611_p5, 1, 0 }
  0x47   : > { %s1053_s13 = sshll.u32 %s239_s12, 3  ;;  %s1624_s14 = scalar_lea.hbm %s1816_s0, %s1054_s10 }
  0x48   : > { %s243_s15 = scalar_lea.vmem [#allocation2], %s1053_s13  ;;  %p1628_p11 = pnand %p1183_p7, %p43_p9 }
  0x49   : > { %s250_s16 = sshll.u32 %s243_s15, 4  ;;  %s240_s17 = scalar_lea.sflag [#allocation3], %s239_s12  ;;  %s1626_s16 = int_to_ptr.vmem [resolvable:$true] %s250_s16 }
  0x4a   : > { %s1301_s18 = scalar_lea.hbm %s1624_s14, 128  ;;  %p1303_p0 = pneg %p1628_p11 }
  0x4b   : > { %p1302_p12 = scmp.ne.s32.totalorder %s1624_s14, %s1301_s18  ;;  %s1306_s13 = scalar_lea.hbm %s1816_s0, 256 }
  0x4c   : > { %p1307_p13 = scmp.lt.u32.totalorder %s1624_s14, %s1816_s0  ;;  %p1308_p6 = scmp.lt.u32.totalorder %s1306_s13, %s1301_s18 }
  0x4d   : > { %p1304_p2 = pnand %p1303_p0, %p1302_p12  ;;  %p1310_p3 = scmp.lt.u32.totalorder %s1301_s18, %s1624_s14 }
  0x4e   : > { %p1309_p10 = por %p1308_p6, %p1307_p13 }
  0x4f   : > { %p1305_p1 = pneg %p1304_p2 }
  0x50   : > { %p1311_p7 = por %p1310_p3, %p1309_p10 }
  0x52   : > { %p1312_p9 = pnand %p1311_p7, %p1305_p1 }
  0x54   : > { %1315 = shalt.err (!%p1312_p9)
}
  0x55   : > { %s1316_s12 = scalar_lea.vmem %s1626_s16, 128  ;;  %s1439_s20 = smov [#allocation2]  }
  0x56   : > { %p1317_p12 = scmp.ne.s32.totalorder %s1626_s16, %s1316_s12  ;;  %s1321_s15 = sshll.u32 %s1439_s20, 4  ;;  %s1322_s15 = int_to_ptr.vmem [resolvable:$false] %s1321_s15 }
  0x57   : > { %s1323_s8 = scalar_lea.vmem %s1322_s15, 256  ;;  %p1324_p4 = scmp.lt.s32.totalorder %s1626_s16, %s1322_s15 }
  0x58   : > { %p1319_p2 = pnand %p1317_p12, %p1303_p0  ;;  %p1325_p13 = scmp.lt.s32.totalorder %s1323_s8, %s1316_s12 }
  0x5a   : > { %p1320_p5 = pneg %p1319_p2  ;;  %p1326_p6 = por %p1325_p13, %p1324_p4 }
  0x5c   : > { %p1327_p10 = pnand %p1326_p6, %p1320_p5 }
  0x5e   : > { %1330 = shalt.err (!%p1327_p10)
}
  0x5f   : > { %1173 = dma.hbm_to_vmem [thread:$0]  (!%p1628_p11), %s1624_s14, 128, %s1626_s16, %s240_s17  }
  0x60   : > { %259 = sbr.rel (%p1531_p8) target bundleno = 2061 (0x80d), region = 40  ;;  %s1660_s18 = sand.u32 (!%p1531_p8), 1, %s1425_s22  }
  0x61   : > { %s1056_s30 = sshll.u32 (!%p1531_p8), %s1660_s18, 3  ;;  %s262_s13 = scalar_lea.sflag (!%p1531_p8), [#allocation3], %s1660_s18 }
  0x62   : > { %s265_s10 = scalar_lea.vmem (!%p1531_p8), [#allocation2], %s1056_s30  ;;  %p1833_p4 = scmp.ne.s32.totalorder (!%p1531_p8), %s1826_s27, 0 }
  0x67   : > { %1404 = dma.done.wait (%p1833_p4), %s262_s13, 128  }
  0x68   : > { %1406 = vsyncadd (%p1833_p4), %s262_s13, 4294967168  ;;  %p1834_p5 = scmp.eq.s32.totalorder %s1512_s25, 0 }
  0x6a   : > { %1408 = dma.done.wait (%p1834_p5), [#allocation6], 1024   ;;  %p1835_p8 = pmov %p1834_p5 }
  0x6b   : > { %v1440_v0 = vmov 0.0|0.0   ;;  %vm1441_vm0 = vmmov 0   ;;  %v1442_v1 = vmov 0.0   ;;  %v308_v2 = vld [vmem:[#allocation5] sm:$0xff]  ;;  %v309_v3 = vld [vmem:[#allocation5 + $0x8] sm:$0xff]  ;;  %v310_v4 = vld [vmem:[#allocation5 + $0x10] sm:$0xff] }
  0x6c   : > { %1410 = vsyncadd (%p1835_p8), [#allocation6], 4294966272  ;;  %1137 = vmatprep.subr.bf16.mxu0 %v1440_v0  ;;  %1103 = vmatprep.mubr.msk.f32.mxu0 %vm1441_vm0, %v1442_v1  ;;  %v1138_v5 = vpack.c.bf16 %v309_v3, %v308_v2  ;;  %v311_v6 = vld [vmem:[#allocation5 + $0x18] sm:$0xff]  ;;  %vm319_vm1 = vcmask 261120   ;;  %v1061_v9 = vld [vmem:[%s1818_s2] ss:$0 sm:$0xff] }
  0x6d   : > { %1106 = vmatprep.subr.mxu1 %v1442_v1  ;;  %1108 = vmatprep.mubr.msk.f32.mxu1 %vm1441_vm0, %v1442_v1  ;;  %v1141_v7 = vpack.c.bf16 %v311_v6, %v310_v4  ;;  %v307_v8 = vld [vmem:[%s265_s10] sm:$0xff]  ;;  %s1443_s14 = smov 64   ;;  %s1444_s16 = smov 96   ;;  %vm396_vm2 = vcmask 130048   ;;  %vm471_vm3 = vcmask 64512   ;;  %v810_v47 = vld [vmem:[#allocation7] sm:$0xff] }
  0x6e   : > { %1139 = vmatpush3.bf16.msra.mxu0 %v1138_v5  ;;  %s1445_s7 = smov 80   ;;  %s1446_s17 = smov 112   ;;  %v811_v48 = vld [vmem:[#allocation7 + $0x8] sm:$0xff]  ;;  %v812_v49 = vld [vmem:[#allocation7 + $0x10] sm:$0xff]  ;;  %v813_v51 = vld [vmem:[#allocation7 + $0x18] sm:$0xff]  ;;  %vm514_vm4 = vcmask 195584  }
  0x6f   : > { %1140 = vmatprep.subr.bf16.mxu0 %v1440_v0  ;;  %s1447_s19 = smov 48   ;;  %s1448_s12 = smov 16   ;;  %v1144_v50 = vpack.c.bf16 %v811_v48, %v810_v47  ;;  %v1147_v52 = vpack.c.bf16 %v813_v51, %v812_v49  ;;  %vm517_vm5 = vcmask 326656   ;;  %vm521_vm6 = vcmask 457728  }
  0x70   : > { %s1449_s20 = smov 24   ;;  %s1450_s15 = smov 32   ;;  %vm519_vm7 = vcmask 392192   ;;  %vm801_vm8 = vcmask 1040384   ;;  %vm803_vm9 = vcmask 517120  }
  0x71   : > { %s1451_s8 = smov 40   ;;  %s1452_s13 = smov 8  }
  0x72   : > { %1142 = vmatpush3.bf16.msra.mxu0 %v1141_v7  ;;  %s1453_s10 = smov 56   ;;  %s1059_s27 = sshll.u32 %s1660_s18, 1 }
  0x73   : > { %1143 = vmatprep.subr.bf16.mxu0 %v1440_v0  ;;  %s299_s29 = scalar_lea.vmem [#allocation8], %s1059_s27  ;;  %p1836_p0 = scmp.ne.s32.totalorder %s1831_s9, 0 }
  0x75   : > { %1104 = vmatmul.mubr.msk.f32.vlgmr.msra.gmra.mrb[0].mxu0 %vm319_vm1, %v307_v8 }
  0x76   : > { %1134 = vmatprep.mubr.msk.f32.mxu0 %vm1441_vm0, %v1442_v1  ;;  %1145 = vmatpush3.bf16.msra.mxu0 %v1144_v50 }
  0x77   : > { %1146 = vmatprep.subr.bf16.mxu0 %v1440_v0 }
  0x7a   : > { %1148 = vmatpush3.bf16.msra.mxu0 %v1147_v52 }
 0x148   : > { %v389_v10 = vpop.f32.mrb[0].mxu0 }
 0x149   : > { %v390_v11 = vadd.f32 %v1061_v9, %v389_v10  ;;  %v1105_v12 = vpop.f32.mrb[1].mxu0 }
 0x14b   : > { %523 = vrot.lane.b32.xlu1 %v390_v11, %s1443_s14  ;;  %394 = vrot.lane.b32.xlu0 %v390_v11, %s1444_s16  ;;  %s1073_s14 = sshll.u32 %s1512_s25, 5 }
 0x14f   : > { %600 = vrot.lane.b32.xlu1 %v390_v11, %s1445_s7 }
 0x1bd   : > { %v395_v13 = vpop.permute.xlu0 %394  ;;  %v524_v14 = vpop.permute.xlu1 %523 }
 0x1be   : > { %1107 = vmatpush3.xpose.msk.msra.mxu1 %vm396_vm2, %v395_v13 }
 0x1bf   : > { %1111 = vmatprep.subr.mxu1 %v1442_v1 }
 0x1c1   : > { %1109 = vmatmul.mubr.msk.f32.vlgmr.msra.gmra.mrb[0].mxu1 %vm396_vm2, %v390_v11  ;;  %v601_v23 = vpop.permute.xlu1 %600 }
 0x1c2   : > { %1112 = vmatpush3.msra.mxu1 %v524_v14  ;;  %1113 = vmatprep.mubr.msk.f32.mxu1 %vm1441_vm0, %v1442_v1 }
 0x1c3   : > { %1116 = vmatprep.subr.mxu1 %v1442_v1 }
 0x294   : > { %v467_v15 = vpop.f32.mrb[0].mxu1 }
 0x295   : > { %v1110_v16 = vpop.f32.mrb[1].mxu1  ;;  %v472_v17 = vsel %vm471_vm3, %v467_v15, -inf }
 0x296   : > { %473 = vmax.xlane.f32.xlu0 %v472_v17 }
 0x323   : > { %v474_v18 = vpop.xlane.xlu0 %473 }
 0x324   : > { %v475_v19 = vsub.f32 %v467_v15, %v474_v18 }
 0x326   : > { %v476_v20 = vmul.f32 1.442695, %v475_v19 }
 0x328   : > { %1237 = vpow2.f32 %v476_v20 }
 0x332   : > { %v1238_v21 = vpop.eup %1237 }
 0x333   : > { %v478_v22 = vsel %vm471_vm3, %v1238_v21, 0.0 }
 0x334   : > { %479 = vadd.xlane.f32.xlu1 %v478_v22 }
 0x345   : > { %598 = vrot.lane.b32.xlu1 %v390_v11, %s1446_s17  ;;  %s1742_s17 = scalar_lea.hbm %s1821_s5, %s1073_s14 }
 0x3c1   : > { %v480_v24 = vpop.xlane.xlu1 %479 }
 0x3c2   : > { %1239 = vrcp.f32 %v480_v24 }
 0x3c5   : > { %v599_v27 = vpop.permute.xlu1 %598 }
 0x3cc   : > { %v1240_v25 = vpop.eup %1239 }
 0x3cd   : > { %v1689_v26 = vmul.f32 %v1240_v25, %v1238_v21 }
 0x3cf   : > { %1114 = vmatmul.mubr.msk.f32.vlgmr.msra.gmra.mrb[2].mxu1 %vm471_vm3, %v1689_v26  ;;  %v492_v43 = vrot.slane %v1689_v26, 3  ;;  %v496_v44 = vrot.slane %v1689_v26, 4  ;;  %v500_v45 = vrot.slane %v1689_v26, 5  ;;  %v504_v46 = vrot.slane %v1689_v26, 6 }
 0x3d0   : > { %1117 = vmatpush3.xpose.msk.msra.mxu1 %vm396_vm2, %v601_v23  ;;  %1118 = vmatprep.mubr.msk.f32.mxu1 %vm1441_vm0, %v1442_v1  ;;  %v484_v56 = vrot.slane %v1689_v26, 1  ;;  %v488_v58 = vrot.slane %v1689_v26, 2  ;;  %v508_v63 = vrot.slane %v1689_v26, 7 }
 0x3d1   : > { %1121 = vmatprep.subr.mxu1 %v1442_v1 }
 0x3d3   : > { %1119 = vmatmul.mubr.msk.f32.vlgmr.msra.gmra.mrb[4].mxu1 %vm396_vm2, %v599_v27 }
 0x3d4   : > { %1123 = vmatprep.mubr.msk.f32.mxu1 %vm1441_vm0, %v1442_v1 }
 0x4a2   : > { %v1697_v28 = vpop.f32.mrb[2].mxu1 }
 0x4a3   : > { %v1115_v29 = vpop.f32.mrb[3].mxu1 }
 0x4a6   : > { %v672_v30 = vpop.f32.mrb[4].mxu1 }
 0x4a7   : > { %v1120_v31 = vpop.f32.mrb[5].mxu1  ;;  %v676_v32 = vsel %vm471_vm3, %v672_v30, -inf }
 0x4a8   : > { %677 = vmax.xlane.f32.xlu1 %v676_v32 }
 0x535   : > { %v678_v33 = vpop.xlane.xlu1 %677 }
 0x536   : > { %v679_v34 = vsub.f32 %v672_v30, %v678_v33 }
 0x538   : > { %v680_v35 = vmul.f32 1.442695, %v679_v34 }
 0x53a   : > { %1241 = vpow2.f32 %v680_v35 }
 0x544   : > { %v1242_v36 = vpop.eup %1241 }
 0x545   : > { %v682_v37 = vsel %vm471_vm3, %v1242_v36, 0.0 }
 0x546   : > { %683 = vadd.xlane.f32.xlu0 %v682_v37 }
 0x55c   : > { %723 = vrot.lane.b32.xlu0 %v390_v11, %s1447_s19 }
 0x5d3   : > { %v684_v38 = vpop.xlane.xlu0 %683 }
 0x5d4   : > { %1243 = vrcp.f32 %v684_v38 }
 0x5d7   : > { %v724_v39 = vpop.permute.xlu0 %723 }
 0x5d8   : > { %1122 = vmatpush3.msra.mxu1 %v724_v39 }
 0x5de   : > { %v1244_v40 = vpop.eup %1243 }
 0x5df   : > { %v1702_v41 = vmul.f32 %v1244_v40, %v1242_v36 }
 0x5e1   : > { %1124 = vmatmul.mubr.msk.f32.vlgmr.msra.gmra.mrb[6].mxu1 %vm471_vm3, %v1702_v41  ;;  %v692_v42 = vrot.slane %v1702_v41, 2  ;;  %v688_v55 = vrot.slane %v1702_v41, 1  ;;  %v696_v57 = vrot.slane %v1702_v41, 3  ;;  %v700_v59 = vrot.slane %v1702_v41, 4 }
 0x5e2   : > { %v704_v60 = vrot.slane %v1702_v41, 5  ;;  %v708_v61 = vrot.slane %v1702_v41, 6  ;;  %v712_v62 = vrot.slane %v1702_v41, 7 }
 0x5e3   : > { %693 = vrot.lane.b32.xlu1 %v692_v42, %s1448_s12 }
 0x5e7   : > { %493 = vrot.lane.b32.xlu1 %v492_v43, %s1449_s20 }
 0x5eb   : > { %497 = vrot.lane.b32.xlu1 %v496_v44, %s1450_s15 }
 0x5ef   : > { %501 = vrot.lane.b32.xlu1 %v500_v45, %s1451_s8 }
 0x5f3   : > { %505 = vrot.lane.b32.xlu1 %v504_v46, %s1447_s19 }
 0x655   : > { %v694_v4 = vpop.permute.xlu1 %693 }
 0x659   : > { %v494_v7 = vpop.permute.xlu1 %493 }
 0x65d   : > { %v498_v9 = vpop.permute.xlu1 %497 }
 0x661   : > { %v502_v17 = vpop.permute.xlu1 %501 }
 0x6b4   : > { %v794_v53 = vpop.f32.mrb[6].mxu1 }
 0x6b5   : > { %806 = vrot.lane.b32.xlu0 %v794_v53, %s1448_s12  ;;  %v1125_v54 = vpop.f32.mrb[7].mxu1 }
 0x6b9   : > { %689 = vrot.lane.b32.xlu0 %v688_v55, %s1452_s13 }
 0x6bd   : > { %485 = vrot.lane.b32.xlu0 %v484_v56, %s1452_s13 }
 0x6c1   : > { %697 = vrot.lane.b32.xlu0 %v696_v57, %s1449_s20 }
 0x6c5   : > { %489 = vrot.lane.b32.xlu0 %v488_v58, %s1448_s12  ;;  %s896_s12 = scalar_lea.sflag [#allocation4], %s1660_s18 }
 0x6c9   : > { %701 = vrot.lane.b32.xlu0 %v700_v59, %s1450_s15  ;;  %s1454_s15 = smov [#allocation8]  }
 0x6cd   : > { %705 = vrot.lane.b32.xlu0 %v704_v60, %s1451_s8  ;;  %s1335_s8 = sshll.u32 %s1454_s15, 4  ;;  %s1336_s8 = int_to_ptr.vmem [resolvable:$false] %s1335_s8 }
 0x6ce   : > { %s1337_s13 = scalar_lea.vmem %s1336_s8, 64 }
 0x6d1   : > { %709 = vrot.lane.b32.xlu0 %v708_v61, %s1447_s19  ;;  %s914_s19 = sshll.u32 %s299_s29, 4  ;;  %s915_s19 = int_to_ptr.vmem [resolvable:$true] %s914_s19 }
 0x6d2   : > { %s1331_s20 = scalar_lea.vmem %s915_s19, 32  ;;  %p1338_p7 = scmp.lt.s32.totalorder %s915_s19, %s1336_s8 }
 0x6d3   : > { %p1332_p11 = scmp.ne.s32.totalorder %s915_s19, %s1331_s20  ;;  %p1339_p9 = scmp.lt.s32.totalorder %s1337_s13, %s1331_s20 }
 0x6d5   : > { %713 = vrot.lane.b32.xlu0 %v712_v62, %s1453_s10  ;;  %p1333_p1 = pnand %p1332_p11, %p1836_p0  ;;  %p1340_p12 = por %p1339_p9, %p1338_p7 }
 0x6d7   : > { %p1334_p3 = pneg %p1333_p1 }
 0x6d9   : > { %509 = vrot.lane.b32.xlu0 %v508_v63, %s1453_s10  ;;  %p1341_p2 = pnand %p1340_p12, %p1334_p3 }
 0x727   : > { %v807_v0 = vpop.permute.xlu0 %806 }
 0x728   : > { %v809_v1 = vsel %vm396_vm2, %v1697_v28, %v807_v0 }
 0x729   : > { %1135 = vmatmul.mubr.msk.f32.vlgmr.msra.gmra.mrb[2].mxu0 %vm319_vm1, %v809_v1 }
 0x72b   : > { %v690_v2 = vpop.permute.xlu0 %689 }
 0x72c   : > { %v716_v13 = vsel %vm471_vm3, %v1702_v41, %v690_v2 }
 0x72d   : > { %v717_v15 = vsel %vm396_vm2, %v716_v13, %v694_v4 }
 0x72f   : > { %v486_v3 = vpop.permute.xlu0 %485 }
 0x730   : > { %v512_v10 = vsel %vm471_vm3, %v1689_v26, %v486_v3  ;;  %v506_v26 = vpop.permute.xlu1 %505 }
 0x733   : > { %v698_v5 = vpop.permute.xlu0 %697 }
 0x734   : > { %v718_v18 = vsel %vm514_vm4, %v717_v15, %v698_v5 }
 0x737   : > { %v490_v6 = vpop.permute.xlu0 %489 }
 0x738   : > { %v513_v11 = vsel %vm396_vm2, %v512_v10, %v490_v6 }
 0x739   : > { %v515_v14 = vsel %vm514_vm4, %v513_v11, %v494_v7 }
 0x73a   : > { %v516_v19 = vsel %vm319_vm1, %v515_v14, %v498_v9 }
 0x73b   : > { %v702_v8 = vpop.permute.xlu0 %701  ;;  %v518_v25 = vsel %vm517_vm5, %v516_v19, %v502_v17 }
 0x73c   : > { %v719_v20 = vsel %vm319_vm1, %v718_v18, %v702_v8  ;;  %v520_v28 = vsel %vm519_vm7, %v518_v25, %v506_v26 }
 0x73f   : > { %v706_v12 = vpop.permute.xlu0 %705 }
 0x740   : > { %v720_v21 = vsel %vm517_vm5, %v719_v20, %v706_v12 }
 0x743   : > { %v710_v16 = vpop.permute.xlu0 %709 }
 0x744   : > { %v721_v22 = vsel %vm519_vm7, %v720_v21, %v710_v16 }
 0x747   : > { %v714_v23 = vpop.permute.xlu0 %713 }
 0x748   : > { %v722_v24 = vsel %vm521_vm6, %v721_v22, %v714_v23 }
 0x749   : > { %v799_v27 = vrot.slane %v722_v24, 7 }
 0x74b   : > { %v510_v29 = vpop.permute.xlu0 %509 }
 0x74c   : > { %v522_v30 = vsel %vm521_vm6, %v520_v28, %v510_v29 }
 0x74d   : > { %v802_v31 = vsel %vm801_vm8, %v522_v30, %v799_v27 }
 0x74e   : > { %804 = vst.msk [vmem:[%s299_s29] sm:$0x3] %vm803_vm9, %v802_v31 }
 0x74f   : > { %1344 = shalt.err (!%p1341_p2)
}
 0x750   : > { %s1345_s10 = scalar_lea.hbm %s1742_s17, 32  ;;  %s1349_s14 = scalar_lea.hbm %s1821_s5, 64 }
 0x751   : > { %p1346_p13 = scmp.ne.s32.totalorder %s1742_s17, %s1345_s10  ;;  %p1350_p4 = scmp.lt.u32.totalorder %s1742_s17, %s1821_s5 }
 0x752   : > { %p1351_p5 = scmp.lt.u32.totalorder %s1349_s14, %s1345_s10  ;;  %p1353_p11 = scmp.lt.u32.totalorder %s1345_s10, %s1742_s17 }
 0x753   : > { %p1347_p6 = pnand %p1346_p13, %p1836_p0 }
 0x754   : > { %p1352_p8 = por %p1351_p5, %p1350_p4 }
 0x755   : > { %p1348_p10 = pneg %p1347_p6 }
 0x756   : > { %p1354_p1 = por %p1353_p11, %p1352_p8 }
 0x758   : > { %p1355_p3 = pnand %p1354_p1, %p1348_p10 }
 0x75a   : > { %1358 = shalt.err (!%p1355_p3)
}
 0x75b   : > { %1159 = dma.vmem_to_hbm [thread:$0]  (%p1836_p0), %s915_s19, 32, %s1742_s17, %s896_s12   ;;  %v1069_v32 = vld [vmem:[%s1820_s4] ss:$0 sm:$0xff] }
 0x75c   : > { %s1074_s8 = sshll.u32 %s1512_s25, 7  ;;  %s306_s13 = scalar_lea.vmem [#allocation9], %s1056_s30 }
 0x75d   : > { %s927_s27 = sshll.u32 %s306_s13, 4  ;;  %s1771_s14 = scalar_lea.hbm %s1822_s6, %s1074_s8  ;;  %s1773_s27 = int_to_ptr.vmem [resolvable:$true] %s927_s27 }
 0x75e   : > { %s901_s17 = scalar_lea.sflag [#allocation10], %s1660_s18  ;;  %s1359_s25 = scalar_lea.vmem %s1773_s27, 128 }
 0x75f   : > { %p1360_p7 = scmp.ne.s32.totalorder %s1773_s27, %s1359_s25  ;;  %s1455_s30 = smov [#allocation9]  }
 0x760   : > { %s1363_s19 = sshll.u32 %s1455_s30, 4  ;;  %s1364_s19 = int_to_ptr.vmem [resolvable:$false] %s1363_s19 }
 0x761   : > { %p1361_p9 = pnand %p1360_p7, %p1836_p0  ;;  %s1365_s12 = scalar_lea.vmem %s1364_s19, 256 }
 0x762   : > { %p1366_p2 = scmp.lt.s32.totalorder %s1773_s27, %s1364_s19  ;;  %p1367_p13 = scmp.lt.s32.totalorder %s1365_s12, %s1359_s25 }
 0x763   : > { %p1362_p12 = pneg %p1361_p9 }
 0x764   : > { %p1368_p6 = por %p1367_p13, %p1366_p2 }
 0x766   : > { %p1369_p10 = pnand %p1368_p6, %p1362_p12 }
 0x7fc   : > { %v890_v33 = vpop.f32.mrb[2].mxu0 }
 0x7fd   : > { %v891_v34 = vadd.f32 %v1069_v32, %v890_v33  ;;  %v1136_v35 = vpop.f32.mrb[3].mxu0 }
 0x7ff   : > { %894 = vst.msk [vmem:[%s306_s13] sm:$0xff] %vm319_vm1, %v891_v34 }
 0x800   : > { %1372 = shalt.err (!%p1369_p10)
}
 0x801   : > { %s1373_s18 = scalar_lea.hbm %s1771_s14, 128  ;;  %s1377_s20 = scalar_lea.hbm %s1822_s6, 256 }
 0x802   : > { %p1374_p4 = scmp.ne.s32.totalorder %s1771_s14, %s1373_s18  ;;  %p1378_p11 = scmp.lt.u32.totalorder %s1771_s14, %s1822_s6 }
 0x803   : > { %p1379_p1 = scmp.lt.u32.totalorder %s1377_s20, %s1373_s18  ;;  %p1381_p7 = scmp.lt.u32.totalorder %s1373_s18, %s1771_s14 }
 0x804   : > { %p1375_p5 = pnand %p1374_p4, %p1836_p0 }
 0x805   : > { %p1380_p3 = por %p1379_p1, %p1378_p11 }
 0x806   : > { %p1376_p8 = pneg %p1375_p5 }
 0x807   : > { %p1382_p9 = por %p1381_p7, %p1380_p3 }
 0x809   : > { %p1383_p12 = pnand %p1382_p9, %p1376_p8 }
 0x80b   : > { %1386 = shalt.err (!%p1383_p12)
}
 0x80c   : > { %1160 = dma.vmem_to_hbm [thread:$0]  (%p1836_p0), %s1773_s27, 128, %s1771_s14, %s901_s17  }
 0x80d PF: > { %s939_s13 = sand.u32 1, %s1421_s21   ;;  %p1837_p2 = scmp.ne.s32.totalorder %s1827_s28, 0 }
 0x80e   : > { %p1838_p13 = scmp.ge.s32.totalorder %s1433_s24, 2  ;;  %s940_s10 = scalar_lea.sflag [#allocation4], %s939_s13 }
 0x810   : > { %p1175_p6 = pnand %p1838_p13, %p1837_p2 }
 0x812   : > { %1412 = dma.done.wait (!%p1175_p6), %s940_s10, 32  }
 0x813   : > { %1414 = vsyncadd (!%p1175_p6), %s940_s10, 4294967264  ;;  %s949_s29 = scalar_lea.sflag [#allocation10], %s939_s13 }
 0x814   : > { %1416 = dma.done.wait (!%p1175_p6), %s949_s29, 128  }
 0x815   : > { %1418 = vsyncadd (!%p1175_p6), %s949_s29, 4294967168  ;;  %p24_p0 = scmp.ge.s32.totalorder %s1601_s26, 4   ;;  %s1839_s21 = smov %s1425_s22 }
 0x816   : > { %s1840_s22 = smov %s1429_s23  ;;  %s1841_s23 = smov %s1617_s11 }
 0x817   : > { %s1842_s24 = smov %s1601_s26  ;;  %26 = sbr.rel (!%p24_p0) target bundleno = 8 (0x8), region = 110 }
 0x81e   :  { %954 = vsyncpa [#allocation3], 1 }
 0x81f   :  { %956 = vsyncpa [#allocation3 + $0x1], 1 }
 0x820   :  { %957 = vsyncpa [#allocation6], 1 }
 0x821   :  { %958 = vsyncpa [#allocation4], 1 }
 0x822   :  { %960 = vsyncpa [#allocation4 + $0x1], 1 }
 0x823   :  { %961 = vsyncpa [#allocation10], 1 }
 0x824   :  { %963 = vsyncpa [#allocation10 + $0x1], 1 }

</bundles_post_ra>
